<compile_context>
chip_gen: v5e
topology: v5e:2x2
jax: 0.10.0
libtpu: 0.0.40
codegen_flags: <defaults>
</compile_context>

<pallas_src>
import jax
import jax.numpy as jnp
from jax.experimental import pallas as pl
from jax.experimental.pallas import tpu as pltpu


def _make_mlp_kernel(num_layers):
    """Fused MLP kernel, batch-on-lanes layout.

    Ref order: x_t, (w0, b0), (w1, b1), ..., out_t
    Activations are (features, batch_tile); each layer computes h = W @ h + b
    with tanh after every layer except the last (matches the PyTorch
    Sequential built in DNN.__init__).
    """

    def kernel(*refs):
        out_ref = refs[-1]
        h = refs[0][...]                                    # (d_in, bt) f32
        for i in range(num_layers):
            w = refs[1 + 2 * i][...]                        # (out, in)
            b = refs[2 + 2 * i][...]                        # (out, 1) -> bcast on lanes
            h = jnp.dot(w, h, preferred_element_type=jnp.float32) + b
            if i < num_layers - 1:
                h = jnp.tanh(h)
        out_ref[...] = h.astype(out_ref.dtype)              # (d_out, bt), lane-dense

    return kernel


def _pick_batch_tile(n):
    """Largest lane-aligned tile that still (if possible) yields a grid >= 2.

    Keeps the per-step work far above the ~0.35us grid-step overhead while
    keeping the (width, batch_tile) f32 activation well inside the 64-vreg
    file, and leaves >= 2 grid steps so both v7x TensorCores are used.
    """
    for t in (1024, 512, 256, 128):
        if n >= 2 * t:
            return t
    return 128


def dnn_forward(x, params, *, batch_tile=None):
    """Run the DNN forward pass with a single fused Pallas kernel.

    x:      (N, layers[0]) float32
    params: list of (W, b) with W shaped (out_features, in_features) —
            PyTorch-native — and b shaped (out_features, 1).
    Returns (N, layers[-1]) float32.
    """
    n, d_in = x.shape
    num_layers = len(params)
    d_out = params[-1][0].shape[0]

    if batch_tile is None:
        batch_tile = _pick_batch_tile(n)
    assert batch_tile % 128 == 0, "batch_tile must be lane-aligned (multiple of 128)"

    # Pad the batch up to a multiple of the tile (handles ragged batches),
    # and move batch onto the lane axis.  Pure wrapper glue.
    n_pad = ((n + batch_tile - 1) // batch_tile) * batch_tile
    x_t = jnp.zeros((d_in, n_pad), jnp.float32).at[:, :n].set(x.T)

    grid = (n_pad // batch_tile,)

    # x tiled over batch (lanes); weights/biases are full blocks re-used at
    # every grid point (constant block index -> Pallas skips re-DMA).
    in_specs = [pl.BlockSpec((d_in, batch_tile), lambda i: (0, i))]
    flat_args = [x_t]
    flops = 0
    transcendentals = 0
    bytes_accessed = x_t.size * 4 + d_out * n_pad * 4
    for li, (w, b) in enumerate(params):
        in_specs.append(pl.BlockSpec(w.shape, lambda i: (0, 0)))
        in_specs.append(pl.BlockSpec(b.shape, lambda i: (0, 0)))
        flat_args.append(w)
        flat_args.append(b)
        flops += 2 * n_pad * w.shape[0] * w.shape[1] + n_pad * w.shape[0]
        if li < num_layers - 1:
            transcendentals += n_pad * w.shape[0]
        bytes_accessed += (w.size + b.size) * 4

    out_spec = pl.BlockSpec((d_out, batch_tile), lambda i: (0, i))

    kernel = _make_mlp_kernel(num_layers)

    out_t = pl.pallas_call(
        kernel,
        out_shape=jax.ShapeDtypeStruct((d_out, n_pad), jnp.float32),
        grid=grid,
        in_specs=in_specs,
        out_specs=out_spec,
        compiler_params=pltpu.CompilerParams(
            dimension_semantics=("parallel",),
        ),
        cost_estimate=pl.CostEstimate(
            flops=flops,
            transcendentals=transcendentals,
            bytes_accessed=bytes_accessed,
        ),
    )(*flat_args)

    return out_t[:, :n].T


def init_dnn_params(key, layers):
    """Deterministic init mimicking torch.nn.Linear's uniform(-1/sqrt(fan_in), ..).

    Weights are PyTorch-native (out_features, in_features); biases are stored
    as (out_features, 1) so they broadcast over the lane (batch) axis.
    """
    params = []
    for i in range(len(layers) - 1):
        fan_in, fan_out = layers[i], layers[i + 1]
        key, kw, kb = jax.random.split(key, 3)
        bound = 1.0 / jnp.sqrt(jnp.float32(fan_in))
        w = jax.random.uniform(kw, (fan_out, fan_in), jnp.float32, -bound, bound)
        b = jax.random.uniform(kb, (fan_out, 1), jnp.float32, -bound, bound)
        params.append((w, b))
    return params


def dnn_reference(x, params):
    """Plain-JAX reference identical to the PyTorch forward semantics."""
    h = x
    for i, (w, b) in enumerate(params):
        h = h @ w.T + b[:, 0]
        if i < len(params) - 1:
            h = jnp.tanh(h)
    return h


if __name__ == "__main__":
    # Typical PINN-style architecture: 2 inputs (x, t), 3 hidden tanh layers
    # of width 32, 1 output.  batch=256 -> batch_tile=128, grid=(2,): both
    # v7x TensorCores get a tile, and each step is a full lane-dense slab.
    layers = [2, 32, 32, 32, 1]
    batch = 256

    key = jax.random.PRNGKey(0)
    key, kx = jax.random.split(key)
    x = jax.random.normal(kx, (batch, layers[0]), dtype=jnp.float32)

    params = init_dnn_params(key, layers)

    out = dnn_forward(x, params)
    out = jax.block_until_ready(out)

    ref = dnn_reference(x, params)
    assert out.shape == (batch, layers[-1])
    assert jnp.allclose(out, ref, atol=1e-5, rtol=1e-5), "mismatch vs reference"

    print("KERNEL_OK")
</pallas_src>

<mosaic_0001>
module attributes {stable_mosaic.version = 11 : i64} {
  func.func @kernel(%arg0: i32, %arg1: memref<2x128xf32, #tpu.memory_space<vmem>>, %arg2: memref<32x2xf32, #tpu.memory_space<vmem>>, %arg3: memref<32x1xf32, #tpu.memory_space<vmem>>, %arg4: memref<32x32xf32, #tpu.memory_space<vmem>>, %arg5: memref<32x1xf32, #tpu.memory_space<vmem>>, %arg6: memref<32x32xf32, #tpu.memory_space<vmem>>, %arg7: memref<32x1xf32, #tpu.memory_space<vmem>>, %arg8: memref<1x32xf32, #tpu.memory_space<vmem>>, %arg9: memref<1x1xf32, #tpu.memory_space<vmem>>, %arg10: memref<1x128xf32, #tpu.memory_space<vmem>>) attributes {dimension_semantics = [#tpu.dimension_semantics<parallel>], iteration_bounds = array<i64: 2>, scalar_prefetch = 0 : i64, scratch_operands = 0 : i64, tpu.core_type = #tpu.core_type<tc>, window_params = [{transform_indices = @transform_0, window_bounds = array<i64: 2, 128>}, {pipeline_mode = #tpu.pipeline_mode<synchronous>, transform_indices = @transform_1, window_bounds = array<i64: 32, 2>}, {pipeline_mode = #tpu.pipeline_mode<synchronous>, transform_indices = @transform_2, window_bounds = array<i64: 32, 1>}, {pipeline_mode = #tpu.pipeline_mode<synchronous>, transform_indices = @transform_3, window_bounds = array<i64: 32, 32>}, {pipeline_mode = #tpu.pipeline_mode<synchronous>, transform_indices = @transform_4, window_bounds = array<i64: 32, 1>}, {pipeline_mode = #tpu.pipeline_mode<synchronous>, transform_indices = @transform_5, window_bounds = array<i64: 32, 32>}, {pipeline_mode = #tpu.pipeline_mode<synchronous>, transform_indices = @transform_6, window_bounds = array<i64: 32, 1>}, {pipeline_mode = #tpu.pipeline_mode<synchronous>, transform_indices = @transform_7, window_bounds = array<i64: 1, 32>}, {pipeline_mode = #tpu.pipeline_mode<synchronous>, transform_indices = @transform_8, window_bounds = array<i64: 1, 1>}, {transform_indices = @transform_9, window_bounds = array<i64: 1, 128>}]} {
    %c0 = arith.constant 0 : index
    %c0_0 = arith.constant 0 : index
    %0 = vector.load %arg1[%c0, %c0_0] : memref<2x128xf32, #tpu.memory_space<vmem>>, vector<2x128xf32>
    %c0_1 = arith.constant 0 : index
    %c0_2 = arith.constant 0 : index
    %1 = vector.load %arg2[%c0_1, %c0_2] : memref<32x2xf32, #tpu.memory_space<vmem>>, vector<32x2xf32>
    %c0_3 = arith.constant 0 : index
    %c0_4 = arith.constant 0 : index
    %2 = vector.load %arg3[%c0_3, %c0_4] : memref<32x1xf32, #tpu.memory_space<vmem>>, vector<32x1xf32>
    %cst = arith.constant dense<0.000000e+00> : vector<32x128xf32>
    %3 = tpu.matmul %1, %0, %cst {dimension_numbers = #tpu.dot_dimension_numbers<[1], [0], [0], [1], [0, 0, 1, 1], [], []>} : vector<32x2xf32>, vector<2x128xf32>, vector<32x128xf32> -> vector<32x128xf32>
    %4 = vector.broadcast %2 : vector<32x1xf32> to vector<32x128xf32>
    %5 = arith.addf %3, %4 : vector<32x128xf32>
    %6 = math.tanh %5 : vector<32x128xf32>
    %c0_5 = arith.constant 0 : index
    %c0_6 = arith.constant 0 : index
    %7 = vector.load %arg4[%c0_5, %c0_6] : memref<32x32xf32, #tpu.memory_space<vmem>>, vector<32x32xf32>
    %c0_7 = arith.constant 0 : index
    %c0_8 = arith.constant 0 : index
    %8 = vector.load %arg5[%c0_7, %c0_8] : memref<32x1xf32, #tpu.memory_space<vmem>>, vector<32x1xf32>
    %cst_9 = arith.constant dense<0.000000e+00> : vector<32x128xf32>
    %9 = tpu.matmul %7, %6, %cst_9 {dimension_numbers = #tpu.dot_dimension_numbers<[1], [0], [0], [1], [0, 0, 1, 1], [], []>} : vector<32x32xf32>, vector<32x128xf32>, vector<32x128xf32> -> vector<32x128xf32>
    %10 = vector.broadcast %8 : vector<32x1xf32> to vector<32x128xf32>
    %11 = arith.addf %9, %10 : vector<32x128xf32>
    %12 = math.tanh %11 : vector<32x128xf32>
    %c0_10 = arith.constant 0 : index
    %c0_11 = arith.constant 0 : index
    %13 = vector.load %arg6[%c0_10, %c0_11] : memref<32x32xf32, #tpu.memory_space<vmem>>, vector<32x32xf32>
    %c0_12 = arith.constant 0 : index
    %c0_13 = arith.constant 0 : index
    %14 = vector.load %arg7[%c0_12, %c0_13] : memref<32x1xf32, #tpu.memory_space<vmem>>, vector<32x1xf32>
    %cst_14 = arith.constant dense<0.000000e+00> : vector<32x128xf32>
    %15 = tpu.matmul %13, %12, %cst_14 {dimension_numbers = #tpu.dot_dimension_numbers<[1], [0], [0], [1], [0, 0, 1, 1], [], []>} : vector<32x32xf32>, vector<32x128xf32>, vector<32x128xf32> -> vector<32x128xf32>
    %16 = vector.broadcast %14 : vector<32x1xf32> to vector<32x128xf32>
    %17 = arith.addf %15, %16 : vector<32x128xf32>
    %18 = math.tanh %17 : vector<32x128xf32>
    %c0_15 = arith.constant 0 : index
    %c0_16 = arith.constant 0 : index
    %19 = vector.load %arg8[%c0_15, %c0_16] : memref<1x32xf32, #tpu.memory_space<vmem>>, vector<1x32xf32>
    %c0_17 = arith.constant 0 : index
    %c0_18 = arith.constant 0 : index
    %20 = vector.load %arg9[%c0_17, %c0_18] : memref<1x1xf32, #tpu.memory_space<vmem>>, vector<1x1xf32>
    %cst_19 = arith.constant dense<0.000000e+00> : vector<1x128xf32>
    %21 = tpu.matmul %19, %18, %cst_19 {dimension_numbers = #tpu.dot_dimension_numbers<[1], [0], [0], [1], [0, 0, 1, 1], [], []>} : vector<1x32xf32>, vector<32x128xf32>, vector<1x128xf32> -> vector<1x128xf32>
    %22 = vector.broadcast %20 : vector<1x1xf32> to vector<1x128xf32>
    %23 = arith.addf %21, %22 : vector<1x128xf32>
    %c0_20 = arith.constant 0 : index
    %c0_21 = arith.constant 0 : index
    %24 = vector.load %arg10[%c0_20, %c0_21] : memref<1x128xf32, #tpu.memory_space<vmem>>, vector<1x128xf32>
    tpu.vector_store %arg10[%c0_20, %c0_21], %23 {strides = array<i32>} : memref<1x128xf32, #tpu.memory_space<vmem>>, vector<1x128xf32>,
    return
  }
  func.func @transform_0(%arg0: i32) -> (i32, i32) {
    %c0_i32 = arith.constant 0 : i32
    %c0_i32_0 = arith.constant 0 : i32
    return %c0_i32, %arg0 : i32, i32
  }
  func.func @transform_1(%arg0: i32) -> (i32, i32) {
    %c0_i32 = arith.constant 0 : i32
    %c0_i32_0 = arith.constant 0 : i32
    %c0_i32_1 = arith.constant 0 : i32
    return %c0_i32, %c0_i32_0 : i32, i32
  }
  func.func @transform_2(%arg0: i32) -> (i32, i32) {
    %c0_i32 = arith.constant 0 : i32
    %c0_i32_0 = arith.constant 0 : i32
    %c0_i32_1 = arith.constant 0 : i32
    return %c0_i32, %c0_i32_0 : i32, i32
  }
  func.func @transform_3(%arg0: i32) -> (i32, i32) {
    %c0_i32 = arith.constant 0 : i32
    %c0_i32_0 = arith.constant 0 : i32
    %c0_i32_1 = arith.constant 0 : i32
    return %c0_i32, %c0_i32_0 : i32, i32
  }
  func.func @transform_4(%arg0: i32) -> (i32, i32) {
    %c0_i32 = arith.constant 0 : i32
    %c0_i32_0 = arith.constant 0 : i32
    %c0_i32_1 = arith.constant 0 : i32
    return %c0_i32, %c0_i32_0 : i32, i32
  }
  func.func @transform_5(%arg0: i32) -> (i32, i32) {
    %c0_i32 = arith.constant 0 : i32
    %c0_i32_0 = arith.constant 0 : i32
    %c0_i32_1 = arith.constant 0 : i32
    return %c0_i32, %c0_i32_0 : i32, i32
  }
  func.func @transform_6(%arg0: i32) -> (i32, i32) {
    %c0_i32 = arith.constant 0 : i32
    %c0_i32_0 = arith.constant 0 : i32
    %c0_i32_1 = arith.constant 0 : i32
    return %c0_i32, %c0_i32_0 : i32, i32
  }
  func.func @transform_7(%arg0: i32) -> (i32, i32) {
    %c0_i32 = arith.constant 0 : i32
    %c0_i32_0 = arith.constant 0 : i32
    %c0_i32_1 = arith.constant 0 : i32
    return %c0_i32, %c0_i32_0 : i32, i32
  }
  func.func @transform_8(%arg0: i32) -> (i32, i32) {
    %c0_i32 = arith.constant 0 : i32
    %c0_i32_0 = arith.constant 0 : i32
    %c0_i32_1 = arith.constant 0 : i32
    return %c0_i32, %c0_i32_0 : i32, i32
  }
  func.func @transform_9(%arg0: i32) -> (i32, i32) {
    %c0_i32 = arith.constant 0 : i32
    %c0_i32_0 = arith.constant 0 : i32
    return %c0_i32, %arg0 : i32, i32
  }
}

</mosaic_0001>

<bundles_post_ra>
// kernel: tpu_custom_call.1
= control target key start
LH: loop header
LB: loop body
LE: loop exit
PB: predicated region body
PF: predicated region fallthrough
CT: control target
= control target key end

     0   :  { %s1042_s0 = inlined_call_operand.vmem [shape: f32[2,256], index: 0, kind: input, shape index: {}]   ;;  %s1043_s1 = inlined_call_operand.vmem [shape: f32[32,2], index: 1, kind: input, shape index: {}]   ;;  %s1044_s2 = inlined_call_operand.vmem [shape: f32[32,1], index: 2, kind: input, shape index: {}]   ;;  %s1045_s3 = inlined_call_operand.vmem [shape: f32[32,32], index: 3, kind: input, shape index: {}]   ;;  %s1046_s4 = inlined_call_operand.vmem [shape: f32[32,1], index: 4, kind: input, shape index: {}]   ;;  %s1047_s5 = inlined_call_operand.vmem [shape: f32[32,32], index: 5, kind: input, shape index: {}]   ;;  %s1048_s6 = inlined_call_operand.vmem [shape: f32[32,1], index: 6, kind: input, shape index: {}]   ;;  %s1049_s7 = inlined_call_operand.vmem [shape: f32[1,32], index: 7, kind: input, shape index: {}]   ;;  %s1050_s8 = inlined_call_operand.<no memory space> [shape: f32[1,1], index: 8, kind: input, shape index: {}]   ;;  %s1051_s9 = inlined_call_operand.hbm [shape: f32[1,256], index: 9, kind: output, shape index: {}]  }
   0x1   :  { %v14_v0 = vstv %s1050_s8 }
   0x2   :  { %15 = vst [vmem:[#allocation2] sm:$0x1] %v14_v0 }
   0x3   :  { %16 = vsyncpa [#allocation4], 0 }
   0x4   :  { %18 = vsyncpa [#allocation4 + $0x1], 0  ;;  %s869_s11 = smov 0   ;;  %s871_s12 = smov 0  }
   0x5   :  { %s873_s13 = smov 0   ;;  %s875_s14 = smov 0  }
   0x6 LB: > { %s890_s8 = sadd.s32 4294967295, %s813_s14   ;;  %s655_s15 = sadd.s32 4294967294, %s813_s14   ;;  %s813_s14 = sphi %s875_s14, %s1057_s14   ;;  %s809_s13 = sphi %s873_s13, %s1056_s13   ;;  %s805_s12 = sphi %s871_s12, %s1055_s12   ;;  %s801_s11 = sphi %s869_s11, %s1054_s11  }
   0x7   : > { %s894_s16 = sadd.s32 1, %s813_s14   ;;  %s225_s17 = sadd.s32 1, %s809_s13 }
   0x8   : > { %s222_s18 = ssub.s32 %s813_s14, %s894_s16  ;;  %p235_p0 = scmp.ne.s32.totalorder %s809_s13, %s805_s12 }
   0x9   : > { %p223_p1 = scmp.eq.s32.totalorder %s222_s18, 0  ;;  %p236_p2 = scmp.eq.s32.totalorder %s890_s8, 1 }
   0xa   : > { %p241_p3 = scmp.ne.s32.totalorder %s805_s12, %s801_s11  ;;  %p242_p4 = scmp.eq.s32.totalorder %s655_s15, 1 }
   0xb   : > { %s905_s19 = scalar_select %p223_p1, %s809_s13, %s225_s17  }
   0xc   : > { %p907_p5 = por %p236_p2, %p235_p0  ;;  %p911_p6 = por %p242_p4, %p241_p3 }
   0xd   : > { %p658_p7 = scmp.ge.s32.totalorder %s813_s14, 1  ;;  %p291_p8 = scmp.lt.s32.totalorder %s813_s14, 3 }
   0xf   : > { %p292_p9 = pnand %p658_p7, %p291_p8 }
  0x10   : > { %p325_p10 = scmp.lt.s32.totalorder (!%p292_p9), %s890_s8, 1  ;;  %s323_s25 = sand.u32 (!%p292_p9), 1, %s805_s12  }
  0x11   : > { %295 = sbr.rel (%p292_p9) target bundleno = 649 (0x289), region = 56  ;;  %s596_s28 = scalar_lea.hbm (!%p292_p9), %s1051_s9, %s890_s8 }
  0x12   : > { %s324_s29 = scalar_lea.vmem (!%p292_p9), [#allocation3], %s323_s25  ;;  %s600_s10 = sshll.u32 (!%p292_p9), %s596_s28, 4  ;;  %s601_s10 = int_to_ptr.hbm [resolvable:$true] %s600_s10 }
  0x13   : > { %s588_s15 = scalar_lea.sflag (!%p292_p9), [#allocation4], %s323_s25  ;;  %s765_s17 = sshra.s32 (!%p292_p9), %s601_s10, 4  ;;  %s766_s17 = int_to_ptr.hbm [resolvable:$true] %s765_s17 }
  0x14   : > { %s767_s18 = scalar_lea.hbm (!%p292_p9), %s766_s17, 1  ;;  %s771_s23 = scalar_lea.hbm (!%p292_p9), %s1051_s9, 2 }
  0x15   : > { %p768_p11 = scmp.ne.s32.totalorder (!%p292_p9), %s766_s17, %s767_s18  ;;  %p772_p0 = scmp.lt.s32.totalorder (!%p292_p9), %s766_s17, %s1051_s9 }
  0x16   : > { %v337_v1 = vld [vmem:[%s1044_s2 + $0x18] sm:$0xff]  ;;  %v815_v2 = vmov 0   ;;  %v335_v3 = vld [vmem:[%s1044_s2 + $0x8] sm:$0xff]  ;;  %s326_s26 = scalar_select %p325_p10, %s890_s8, 1  ;;  %vm371_vm0 = vcmask 1041408   ;;  %v330_v4 = vld [vmem:[%s1043_s1] sm:$0xff] }
  0x17   : > { %724 = vset.pattern.permute.xlu0 %v815_v2  ;;  %725 = vset.pattern.permute.xlu1 %v815_v2  ;;  %vm358_vm1 = vcmask 15360   ;;  %v336_v6 = vld [vmem:[%s1044_s2 + $0x10] sm:$0xff]  ;;  %v334_v7 = vld [vmem:[%s1044_s2] sm:$0xff]  ;;  %v331_v8 = vld [vmem:[%s1043_s1 + $0x8] sm:$0xff]  ;;  %vm436_vm2 = vcmask 261120   ;;  %p769_p12 = pnand %p768_p11, %p907_p5  ;;  %p773_p1 = scmp.lt.s32.totalorder %s771_s23, %s767_s18 }
  0x18   : > { %355 = vperm.xlu0 %724, %v337_v1   ;;  %345 = vperm.xlu1 %725, %v335_v3   ;;  %s659_s27 = sshll.u32 %s326_s26, 1  ;;  %v413_v9 = vld [vmem:[%s1046_s4 + $0x8] sm:$0xff]  ;;  %v412_v10 = vld [vmem:[%s1046_s4] sm:$0xff]  ;;  %v332_v11 = vld [vmem:[%s1043_s1 + $0x10] sm:$0xff] }
  0x19   : > { %726 = vset.pattern.permute.xlu2 %v815_v2  ;;  %s328_s30 = scalar_lea.vmem %s1042_s0, %s659_s27  ;;  %v488_v12 = vld [vmem:[%s1048_s6 + $0x10] sm:$0xff]  ;;  %v487_v13 = vld [vmem:[%s1048_s6 + $0x8] sm:$0xff]  ;;  %v333_v14 = vld [vmem:[%s1043_s1 + $0x18] sm:$0xff]  ;;  %p770_p13 = pneg %p769_p12 }
  0x1a   : > { %v329_v5 = vld [vmem:[%s328_s30] sm:$0x3]  ;;  %v415_v25 = vld [vmem:[%s1046_s4 + $0x18] sm:$0xff]  ;;  %v414_v29 = vld [vmem:[%s1046_s4 + $0x10] sm:$0xff]  ;;  %s598_s30 = sshll.u32 %s324_s29, 4  ;;  %p774_p2 = por %p773_p1, %p772_p0  ;;  %s599_s30 = int_to_ptr.vmem [resolvable:$true] %s598_s30 }
  0x1b   : > { %660 = vmatpush.msk.msra.mxu0 %vm371_vm0, %v329_v5  ;;  %v556_v15 = vld [vmem:[#allocation2] sm:$0x1]  ;;  %433 = vperm.xlu2 %726, %v415_v25   ;;  %v411_v34 = vld [vmem:[%s1045_s3 + $0x18] sm:$0xff]  ;;  %v409_v37 = vld [vmem:[%s1045_s3 + $0x8] sm:$0xff] }
  0x1c   : > { %661 = vmatmul.msk.f32.vlgmr.msra.gmra.mxu0 %vm358_vm1, %v330_v4  ;;  %v408_v33 = vld [vmem:[%s1045_s3] sm:$0xff]  ;;  %v489_v36 = vld [vmem:[%s1048_s6 + $0x18] sm:$0xff]  ;;  %v410_v39 = vld [vmem:[%s1045_s3 + $0x10] sm:$0xff]  ;;  %p775_p3 = pnand %p774_p2, %p770_p13 }
  0x1d   : > { %v486_v38 = vld [vmem:[%s1048_s6] sm:$0xff]  ;;  %v485_v56 = vld [vmem:[%s1047_s5 + $0x18] sm:$0xff]  ;;  %v483_v58 = vld [vmem:[%s1047_s5 + $0x8] sm:$0xff] }
  0x1e   : > { %v482_v55 = vld [vmem:[%s1047_s5] sm:$0xff]  ;;  %v484_v59 = vld [vmem:[%s1047_s5 + $0x10] sm:$0xff] }
  0x20   : > { %350 = vperm.xlu0 %724, %v336_v6   ;;  %340 = vperm.xlu1 %725, %v334_v7  }
  0x23   : > { %428 = vperm.xlu2 %726, %v414_v29  }
  0x24   : > { %662 = vmatmul.msk.f32.gmra.mxu0 %vm358_vm1, %v331_v8 }
  0x28   : > { %423 = vperm.xlu0 %724, %v413_v9   ;;  %418 = vperm.xlu1 %725, %v412_v10  }
  0x2b   : > { %507 = vperm.xlu2 %726, %v489_v36  }
  0x2c   : > { %663 = vmatmul.msk.f32.gmra.mxu0 %vm358_vm1, %v332_v11  ;;  %v555_v11 = vld [vmem:[%s1049_s7] sm:$0x1] }
  0x30   : > { %502 = vperm.xlu0 %724, %v488_v12   ;;  %497 = vperm.xlu1 %725, %v487_v13  }
  0x33   : > { %492 = vperm.xlu2 %726, %v486_v38  }
  0x34   : > { %664 = vmatmul.msk.f32.gmra.mxu0 %vm358_vm1, %v333_v14 }
  0x38   : > { %559 = vperm.xlu0 %724, %v556_v15  }
  0x75   : > { %v434_v41 = vpop.permute.xlu2 %433 }
  0x7d   : > { %v429_v47 = vpop.permute.xlu2 %428 }
  0x85   : > { %v508_v60 = vpop.permute.xlu2 %507 }
  0x8a   : > { %v356_v18 = vpop.permute.xlu0 %355  ;;  %v346_v19 = vpop.permute.xlu1 %345 }
  0x8d   : > { %v493_v7 = vpop.permute.xlu2 %492 }
  0x92   : > { %v351_v21 = vpop.permute.xlu0 %350  ;;  %v341_v26 = vpop.permute.xlu1 %340 }
  0x99   : > { %v392_v16 = vpop.f32.mrf.mxu0 }
  0x9a   : > { %v393_v28 = vadd.f32 %v392_v16, %v341_v26  ;;  %v424_v46 = vpop.permute.xlu0 %423  ;;  %v419_v51 = vpop.permute.xlu1 %418 }
  0xa1   : > { %v395_v17 = vpop.f32.mrf.mxu0 }
  0xa2   : > { %v396_v27 = vadd.f32 %v395_v17, %v346_v19  ;;  %v503_v2 = vpop.permute.xlu0 %502  ;;  %v498_v3 = vpop.permute.xlu1 %497 }
  0xa9   : > { %v398_v20 = vpop.f32.mrf.mxu0 }
  0xaa   : > { %v399_v23 = vadd.f32 %v398_v20, %v351_v21  ;;  %v560_v13 = vpop.permute.xlu0 %559 }
  0xab   : > { %v562_v14 = vperm.slane %v560_v13, 0 }
  0xb1   : > { %v401_v22 = vpop.f32.mrf.mxu0 }
  0xb2   : > { %v402_v24 = vadd.f32 %v401_v22, %v356_v18 }
  0xb4   : > { %727 = vtanh.f32 %v402_v24 }
  0xb5   : > { %729 = vtanh.f32 %v399_v23 }
  0xb6   : > { %731 = vtanh.f32 %v396_v27 }
  0xb7   : > { %733 = vtanh.f32 %v393_v28 }
  0xba   : > { %v728_v30 = vpop.eup %727 }
  0xbb   : > { %461 = vmatpush.msra.mxu1 %v728_v30  ;;  %676 = vmatpush.msra.mxu3 %v728_v30  ;;  %v730_v31 = vpop.eup %729 }
  0xbc   : > { %v732_v32 = vpop.eup %731 }
  0xbd   : > { %462 = vmatpush.msra.mxu1 %v730_v31  ;;  %677 = vmatpush.msra.mxu3 %v730_v31  ;;  %v734_v35 = vpop.eup %733 }
  0xbf   : > { %463 = vmatpush.msra.mxu1 %v732_v32  ;;  %678 = vmatpush.msra.mxu3 %v732_v32 }
  0xc1   : > { %464 = vmatpush.msra.mxu1 %v734_v35  ;;  %679 = vmatpush.msra.mxu3 %v734_v35 }
  0xc2   : > { %665 = vmatmul.msk.f32.vlgmr.msra.gmra.mxu1 %vm436_vm2, %v408_v33  ;;  %668 = vmatmul.msk.f32.vlgmr.msra.gmra.mxu3 %vm436_vm2, %v411_v34 }
  0xca   : > { %666 = vmatmul.msk.f32.gmra.mxu1 %vm436_vm2, %v409_v37 }
  0xd2   : > { %667 = vmatmul.msk.f32.gmra.mxu1 %vm436_vm2, %v410_v39 }
 0x13f   : > { %v466_v40 = vpop.f32.mrf.mxu1 }
 0x140   : > { %v467_v52 = vadd.f32 %v466_v40, %v419_v51 }
 0x145   : > { %v475_v42 = vpop.f32.mrf.mxu3 }
 0x146   : > { %v476_v43 = vadd.f32 %v475_v42, %v434_v41 }
 0x147   : > { %v469_v44 = vpop.f32.mrf.mxu1 }
 0x148   : > { %735 = vtanh.f32 %v476_v43  ;;  %v470_v49 = vadd.f32 %v469_v44, %v424_v46 }
 0x14e   : > { %v736_v45 = vpop.eup %735 }
 0x14f   : > { %v472_v48 = vpop.f32.mrf.mxu1  ;;  %534 = vmatpush.msra.mxu2 %v736_v45  ;;  %680 = vmatpush.msrb.mxu3 %v736_v45 }
 0x150   : > { %v473_v50 = vadd.f32 %v472_v48, %v429_v47 }
 0x152   : > { %737 = vtanh.f32 %v473_v50 }
 0x153   : > { %739 = vtanh.f32 %v470_v49 }
 0x154   : > { %741 = vtanh.f32 %v467_v52 }
 0x158   : > { %v738_v53 = vpop.eup %737 }
 0x159   : > { %535 = vmatpush.msra.mxu2 %v738_v53  ;;  %681 = vmatpush.msrb.mxu3 %v738_v53  ;;  %v740_v54 = vpop.eup %739 }
 0x15a   : > { %v742_v57 = vpop.eup %741 }
 0x15b   : > { %536 = vmatpush.msra.mxu2 %v740_v54  ;;  %682 = vmatpush.msrb.mxu3 %v740_v54 }
 0x15d   : > { %537 = vmatpush.msra.mxu2 %v742_v57  ;;  %683 = vmatpush.msrb.mxu3 %v742_v57 }
 0x15e   : > { %669 = vmatmul.msk.f32.vlgmr.msra.gmra.mxu2 %vm436_vm2, %v482_v55  ;;  %672 = vmatmul.msk.f32.vlgmr.msrb.gmra.mxu3 %vm436_vm2, %v485_v56 }
 0x166   : > { %670 = vmatmul.msk.f32.gmra.mxu2 %vm436_vm2, %v483_v58 }
 0x16e   : > { %671 = vmatmul.msk.f32.gmra.mxu2 %vm436_vm2, %v484_v59 }
 0x1e1   : > { %v539_v61 = vpop.f32.mrf.mxu2  ;;  %v548_v62 = vpop.f32.mrf.mxu3 }
 0x1e2   : > { %v549_v63 = vadd.f32 %v548_v62, %v508_v60  ;;  %v540_v8 = vadd.f32 %v539_v61, %v493_v7 }
 0x1e4   : > { %743 = vtanh.f32 %v549_v63 }
 0x1e9   : > { %v542_v0 = vpop.f32.mrf.mxu2 }
 0x1ea   : > { %v744_v1 = vpop.eup %743  ;;  %v543_v5 = vadd.f32 %v542_v0, %v498_v3 }
 0x1eb   : > { %578 = vmatpush.msra.mxu3 %v744_v1 }
 0x1f1   : > { %v545_v4 = vpop.f32.mrf.mxu2 }
 0x1f2   : > { %v546_v6 = vadd.f32 %v545_v4, %v503_v2 }
 0x1f4   : > { %745 = vtanh.f32 %v546_v6 }
 0x1f5   : > { %747 = vtanh.f32 %v543_v5 }
 0x1f6   : > { %749 = vtanh.f32 %v540_v8 }
 0x1fa   : > { %v746_v9 = vpop.eup %745 }
 0x1fb   : > { %579 = vmatpush.msra.mxu3 %v746_v9  ;;  %v748_v10 = vpop.eup %747 }
 0x1fc   : > { %v750_v12 = vpop.eup %749 }
 0x1fd   : > { %580 = vmatpush.msra.mxu3 %v748_v10 }
 0x1ff   : > { %581 = vmatpush.msra.mxu3 %v750_v12 }
 0x200   : > { %673 = vmatmul.msk.f32.vlgmr.msra.gmra.mxu3 %vm436_vm2, %v555_v11 }
 0x283   : > { %v583_v15 = vpop.f32.mrf.mxu3 }
 0x284   : > { %v584_v16 = vadd.f32 %v583_v15, %v562_v14 }
 0x286   : > { %586 = vst [vmem:[%s324_s29] sm:$0x1] %v584_v16 }
 0x287   : > { %778 = shalt.err (!%p775_p3)
}
 0x288   : > { %684 = dma.vmem_to_hbm [thread:$0]  (%p907_p5), %s599_s30, 16, %s601_s10, %s588_s15  }
 0x289 PF: > { %p690_p4 = scmp.ge.s32.totalorder %s813_s14, 2  ;;  %s612_s25 = sand.u32 1, %s801_s11  }
 0x28a   : > { %s613_s27 = scalar_lea.sflag [#allocation4], %s612_s25 }
 0x28b   : > { %p687_p7 = pnand %p690_p4, %p911_p6 }
 0x28d   : > { %p688_p8 = pneg %p687_p7 }
 0x28f   : > { %796 = dma.done.wait (%p688_p8), %s613_s27, 16  }
 0x290   : > { %798 = vsyncadd (%p688_p8), %s613_s27, 4294967280  ;;  %p21_p9 = scmp.ge.s32.totalorder %s894_s16, 4   ;;  %s1054_s11 = smov %s805_s12 }
 0x291   : > { %s1055_s12 = smov %s809_s13  ;;  %s1056_s13 = smov %s905_s19 }
 0x292   : > { %s1057_s14 = smov %s894_s16  ;;  %23 = sbr.rel (!%p21_p9) target bundleno = 6 (0x6), region = 91 }
 0x297   :  { %618 = vsyncpa [#allocation4], 1 }
 0x298   :  { %620 = vsyncpa [#allocation4 + $0x1], 1 }

</bundles_post_ra>
